<compile_context>
chip_gen: v5e
topology: v5e:2x2
jax: 0.10.0
libtpu: 0.0.40
codegen_flags: <defaults>
</compile_context>

<pallas_src>
import functools

import jax
import jax.numpy as jnp
from jax.experimental import pallas as pl
from jax.experimental.pallas import tpu as pltpu

_LANE = 128          # lane width: pad hidden dims to this so output stores are unmasked
_MAX_BATCH_TILE = 512  # sized against v7x's 32 MiB scoped VMEM (double-buffered x tiles)
_SUBLANE_BF16 = 16   # bf16 sublane packing granularity


def _round_up(n, m):
    return ((n + m - 1) // m) * m


def _pad_to(a, shape):
    pads = tuple((0, t - s) for s, t in zip(a.shape, shape))
    return jnp.pad(a, pads)


def _mlp_head_kernel(x_ref, w1_ref, b1_ref, w2_ref, b2_ref, o_ref):
    # x_ref:  (TB, F)      bf16 batch tile of the flattened observation
    # w1_ref: (F, H1p)     bf16, resident across the whole grid (block idx (0,0))
    # b1_ref: (1, H1p)     f32
    # w2_ref: (H1p, H2p)   bf16, resident
    # b2_ref: (1, H2p)     f32
    # o_ref:  (TB, H2p)    f32, lane-dense (H2p is a multiple of 128)
    h = jnp.dot(x_ref[...], w1_ref[...], preferred_element_type=jnp.float32)
    h = jnp.maximum(h + b1_ref[...], 0.0)
    y = jnp.dot(h.astype(jnp.bfloat16), w2_ref[...],
                preferred_element_type=jnp.float32)
    y = jnp.maximum(y + b2_ref[...], 0.0)
    o_ref[...] = y.astype(o_ref.dtype)


@functools.partial(jax.jit, static_argnames=("channels_last", "out_multi"))
def input_image_block_forward(x, w1, b1, w2, b2, *, channels_last=False,
                              out_multi=False):
    """Forward pass: (permute) -> Flatten -> Linear/ReLU x2 -> (list wrap).

    x : (B, C, H, W) float32 if channels_last=False, else (B, H, W, C).
    w1: (F, H1), b1: (1, H1), w2: (H1, H2), b2: (1, H2) — torch Linear params
        stored as (in, out).
    """
    if channels_last and x.ndim >= 3:
        # _InputImageBlock: NHWC -> NCHW (COLOR / IMAGE / GRAY_3ch obs spaces).
        perm = (0, x.ndim - 1) + tuple(range(1, x.ndim - 1))
        x = jnp.transpose(x, perm)

    B = x.shape[0]
    flat = x.reshape(B, -1).astype(jnp.bfloat16)   # nn.Flatten (row-major) + bf16 MXU path
    F = flat.shape[1]
    H1, H2 = w1.shape[1], w2.shape[1]
    H1p = _round_up(H1, _LANE)
    H2p = _round_up(H2, _LANE)

    # Lane-dense zero-padded weights: identical math on the first H1/H2 lanes,
    # removes masked partial stores (vst.msk) on the output.
    w1p = _pad_to(w1, (F, H1p)).astype(jnp.bfloat16)
    b1p = _pad_to(b1, (1, H1p)).astype(jnp.float32)
    w2p = _pad_to(w2, (H1p, H2p)).astype(jnp.bfloat16)
    b2p = _pad_to(b2, (1, H2p)).astype(jnp.float32)

    # Batch tile: multiple of 16 sublanes (bf16), capped so double-buffered x
    # tiles + resident weights stay well under v7x's 32 MiB scoped VMEM.
    TB = min(_MAX_BATCH_TILE, _round_up(max(B, 1), _SUBLANE_BF16))
    Bp = _round_up(B, TB)
    if Bp != B:
        flat = jnp.pad(flat, ((0, Bp - B), (0, 0)))

    grid = (Bp // TB,)
    flops = 2 * Bp * F * H1p + 2 * Bp * H1p * H2p
    bytes_accessed = (flat.size * 2            # bf16 activations in
                      + w1p.size * 2 + w2p.size * 2
                      + b1p.size * 4 + b2p.size * 4
                      + Bp * H2p * 4)          # f32 out

    out = pl.pallas_call(
        _mlp_head_kernel,
        out_shape=jax.ShapeDtypeStruct((Bp, H2p), jnp.float32),
        grid=grid,
        in_specs=[
            pl.BlockSpec((TB, F), lambda i: (i, 0)),      # x: tiled over batch (pipelined)
            pl.BlockSpec((F, H1p), lambda i: (0, 0)),     # weights: fetched once, stay resident
            pl.BlockSpec((1, H1p), lambda i: (0, 0)),
            pl.BlockSpec((H1p, H2p), lambda i: (0, 0)),
            pl.BlockSpec((1, H2p), lambda i: (0, 0)),
        ],
        out_specs=pl.BlockSpec((TB, H2p), lambda i: (i, 0)),
        compiler_params=pltpu.CompilerParams(
            dimension_semantics=("parallel",)),           # megacore sharding on v7x
        cost_estimate=pl.CostEstimate(
            flops=flops, transcendentals=0, bytes_accessed=bytes_accessed),
    )(flat, w1p, b1p, w2p, b2p)

    out = out[:B, :H2]                                    # drop batch / lane padding
    if out_multi:
        return [out]
    return out


def init_params(key, flat_size, hidden_sizes=(32, 32)):
    """Deterministic synthetic init matching torch.nn.Linear default
    (uniform in +/- 1/sqrt(fan_in)). Weights stored as (in, out)."""
    h1, h2 = hidden_sizes
    k1, k2, k3, k4 = jax.random.split(key, 4)
    lim1 = 1.0 / jnp.sqrt(jnp.float32(flat_size))
    lim2 = 1.0 / jnp.sqrt(jnp.float32(h1))
    w1 = jax.random.uniform(k1, (flat_size, h1), jnp.float32, -lim1, lim1)
    b1 = jax.random.uniform(k2, (1, h1), jnp.float32, -lim1, lim1)
    w2 = jax.random.uniform(k3, (h1, h2), jnp.float32, -lim2, lim2)
    b2 = jax.random.uniform(k4, (1, h2), jnp.float32, -lim2, lim2)
    return w1, b1, w2, b2


def reference_forward(x, w1, b1, w2, b2):
    """Pure-JAX reference mirroring the kernel's bf16-input / f32-accumulate math."""
    flat = x.reshape(x.shape[0], -1).astype(jnp.bfloat16)
    h = jnp.dot(flat, w1.astype(jnp.bfloat16),
                preferred_element_type=jnp.float32) + b1
    h = jnp.maximum(h, 0.0)
    y = jnp.dot(h.astype(jnp.bfloat16), w2.astype(jnp.bfloat16),
                preferred_element_type=jnp.float32) + b2
    return jnp.maximum(y, 0.0)


if __name__ == "__main__":
    key = jax.random.PRNGKey(0)
    kx, kp, kx2 = jax.random.split(key, 3)

    # Observation space: channel-first image (C, H, W) = (4, 16, 16) -> F = 1024
    obs_shape = (4, 16, 16)
    batch = 2
    flat_size = 4 * 16 * 16

    x = jax.random.normal(kx, (batch,) + obs_shape, jnp.float32)
    w1, b1, w2, b2 = init_params(kp, flat_size, hidden_sizes=(32, 32))

    # --- small-batch path (B=2, padded to one 16-row tile) ---
    out = input_image_block_forward(x, w1, b1, w2, b2)
    out = jax.block_until_ready(out)
    ref = reference_forward(x, w1, b1, w2, b2)
    assert out.shape == (batch, 32)
    assert jnp.allclose(out, ref, atol=2e-3, rtol=2e-3)

    # out_multi=True wraps the same tensor in a list (torch semantics).
    out_multi = input_image_block_forward(x, w1, b1, w2, b2, out_multi=True)
    jax.block_until_ready(out_multi[0])
    assert isinstance(out_multi, list) and len(out_multi) == 1
    assert jnp.allclose(out_multi[0], ref, atol=2e-3, rtol=2e-3)

    # channels-last observation (NHWC) exercises the _InputImageBlock permute.
    x_nhwc = jnp.transpose(x, (0, 2, 3, 1))
    out_nhwc = input_image_block_forward(x_nhwc, w1, b1, w2, b2, channels_last=True)
    jax.block_until_ready(out_nhwc)
    assert jnp.allclose(out_nhwc, out, atol=1e-6, rtol=1e-6)

    # --- larger batch exercises the batch grid (2 steps) + batch padding ---
    batch2 = 520  # TB=512 -> padded to 1024, grid=(2,)
    x2 = jax.random.normal(kx2, (batch2,) + obs_shape, jnp.float32)
    out2 = input_image_block_forward(x2, w1, b1, w2, b2)
    out2 = jax.block_until_ready(out2)
    ref2 = reference_forward(x2, w1, b1, w2, b2)
    assert out2.shape == (batch2, 32)
    assert jnp.allclose(out2, ref2, atol=2e-3, rtol=2e-3)

    print("KERNEL_OK")
</pallas_src>

<mosaic_0001>
module attributes {stable_mosaic.version = 11 : i64} {
  func.func @_mlp_head_kernel(%arg0: i32, %arg1: memref<16x1024xbf16, #tpu.memory_space<vmem>>, %arg2: memref<1024x128xbf16, #tpu.memory_space<vmem>>, %arg3: memref<1x128xf32, #tpu.memory_space<vmem>>, %arg4: memref<128x128xbf16, #tpu.memory_space<vmem>>, %arg5: memref<1x128xf32, #tpu.memory_space<vmem>>, %arg6: memref<16x128xf32, #tpu.memory_space<vmem>>) attributes {dimension_semantics = [#tpu.dimension_semantics<parallel>], iteration_bounds = array<i64: 1>, scalar_prefetch = 0 : i64, scratch_operands = 0 : i64, tpu.core_type = #tpu.core_type<tc>, window_params = [{transform_indices = @transform_0, window_bounds = array<i64: 16, 1024>}, {pipeline_mode = #tpu.pipeline_mode<synchronous>, transform_indices = @transform_1, window_bounds = array<i64: 1024, 128>}, {pipeline_mode = #tpu.pipeline_mode<synchronous>, transform_indices = @transform_2, window_bounds = array<i64: 1, 128>}, {pipeline_mode = #tpu.pipeline_mode<synchronous>, transform_indices = @transform_3, window_bounds = array<i64: 128, 128>}, {pipeline_mode = #tpu.pipeline_mode<synchronous>, transform_indices = @transform_4, window_bounds = array<i64: 1, 128>}, {transform_indices = @transform_5, window_bounds = array<i64: 16, 128>}]} {
    %c0 = arith.constant 0 : index
    %c0_0 = arith.constant 0 : index
    %0 = vector.load %arg1[%c0, %c0_0] : memref<16x1024xbf16, #tpu.memory_space<vmem>>, vector<16x1024xbf16>
    %c0_1 = arith.constant 0 : index
    %c0_2 = arith.constant 0 : index
    %1 = vector.load %arg2[%c0_1, %c0_2] : memref<1024x128xbf16, #tpu.memory_space<vmem>>, vector<1024x128xbf16>
    %cst = arith.constant dense<0.000000e+00> : vector<16x128xf32>
    %2 = tpu.matmul %0, %1, %cst {dimension_numbers = #tpu.dot_dimension_numbers<[1], [0], [0], [1], [0, 0, 1, 1], [], []>} : vector<16x1024xbf16>, vector<1024x128xbf16>, vector<16x128xf32> -> vector<16x128xf32>
    %c0_3 = arith.constant 0 : index
    %c0_4 = arith.constant 0 : index
    %3 = vector.load %arg3[%c0_3, %c0_4] : memref<1x128xf32, #tpu.memory_space<vmem>>, vector<1x128xf32>
    %4 = vector.broadcast %3 : vector<1x128xf32> to vector<16x128xf32>
    %5 = arith.addf %2, %4 : vector<16x128xf32>
    %cst_5 = arith.constant 0.000000e+00 : f32
    %6 = vector.broadcast %cst_5 : f32 to vector<16x128xf32>
    %7 = arith.maximumf %5, %6 : vector<16x128xf32>
    %8 = arith.truncf %7 : vector<16x128xf32> to vector<16x128xbf16>
    %c0_6 = arith.constant 0 : index
    %c0_7 = arith.constant 0 : index
    %9 = vector.load %arg4[%c0_6, %c0_7] : memref<128x128xbf16, #tpu.memory_space<vmem>>, vector<128x128xbf16>
    %cst_8 = arith.constant dense<0.000000e+00> : vector<16x128xf32>
    %10 = tpu.matmul %8, %9, %cst_8 {dimension_numbers = #tpu.dot_dimension_numbers<[1], [0], [0], [1], [0, 0, 1, 1], [], []>} : vector<16x128xbf16>, vector<128x128xbf16>, vector<16x128xf32> -> vector<16x128xf32>
    %c0_9 = arith.constant 0 : index
    %c0_10 = arith.constant 0 : index
    %11 = vector.load %arg5[%c0_9, %c0_10] : memref<1x128xf32, #tpu.memory_space<vmem>>, vector<1x128xf32>
    %12 = vector.broadcast %11 : vector<1x128xf32> to vector<16x128xf32>
    %13 = arith.addf %10, %12 : vector<16x128xf32>
    %cst_11 = arith.constant 0.000000e+00 : f32
    %14 = vector.broadcast %cst_11 : f32 to vector<16x128xf32>
    %15 = arith.maximumf %13, %14 : vector<16x128xf32>
    %c0_12 = arith.constant 0 : index
    %c0_13 = arith.constant 0 : index
    %16 = vector.load %arg6[%c0_12, %c0_13] : memref<16x128xf32, #tpu.memory_space<vmem>>, vector<16x128xf32>
    tpu.vector_store %arg6[%c0_12, %c0_13], %15 {strides = array<i32>} : memref<16x128xf32, #tpu.memory_space<vmem>>, vector<16x128xf32>,
    return
  }
  func.func @transform_0(%arg0: i32) -> (i32, i32) {
    %c0_i32 = arith.constant 0 : i32
    %c0_i32_0 = arith.constant 0 : i32
    return %arg0, %c0_i32 : i32, i32
  }
  func.func @transform_1(%arg0: i32) -> (i32, i32) {
    %c0_i32 = arith.constant 0 : i32
    %c0_i32_0 = arith.constant 0 : i32
    %c0_i32_1 = arith.constant 0 : i32
    return %c0_i32, %c0_i32_0 : i32, i32
  }
  func.func @transform_2(%arg0: i32) -> (i32, i32) {
    %c0_i32 = arith.constant 0 : i32
    %c0_i32_0 = arith.constant 0 : i32
    %c0_i32_1 = arith.constant 0 : i32
    return %c0_i32, %c0_i32_0 : i32, i32
  }
  func.func @transform_3(%arg0: i32) -> (i32, i32) {
    %c0_i32 = arith.constant 0 : i32
    %c0_i32_0 = arith.constant 0 : i32
    %c0_i32_1 = arith.constant 0 : i32
    return %c0_i32, %c0_i32_0 : i32, i32
  }
  func.func @transform_4(%arg0: i32) -> (i32, i32) {
    %c0_i32 = arith.constant 0 : i32
    %c0_i32_0 = arith.constant 0 : i32
    %c0_i32_1 = arith.constant 0 : i32
    return %c0_i32, %c0_i32_0 : i32, i32
  }
  func.func @transform_5(%arg0: i32) -> (i32, i32) {
    %c0_i32 = arith.constant 0 : i32
    %c0_i32_0 = arith.constant 0 : i32
    return %arg0, %c0_i32 : i32, i32
  }
}

</mosaic_0001>

<bundles_post_ra>
// kernel: input_image_block_forward.1
= control target key start
LH: loop header
LB: loop body
LE: loop exit
PB: predicated region body
PF: predicated region fallthrough
CT: control target
= control target key end

     0   :  { %s1497_s1 = inlined_call_operand.vmem [shape: bf16[1024,128], index: 1, kind: input, shape index: {}]   ;;  %s1498_s2 = inlined_call_operand.vmem [shape: f32[1,128], index: 2, kind: input, shape index: {}]   ;;  %s1499_s0 = inlined_call_operand.vmem [shape: bf16[16,1024], index: 0, kind: input, shape index: {}]   ;;  %s1500_s4 = inlined_call_operand.vmem [shape: f32[1,128], index: 4, kind: input, shape index: {}]   ;;  %s1501_s3 = inlined_call_operand.vmem [shape: bf16[128,128], index: 3, kind: input, shape index: {}]   ;;  %s1502_s5 = inlined_call_operand.vmem [shape: f32[16,128], index: 5, kind: output, shape index: {}]  }
   0x1   :  { %v1124_v0 = vld [vmem:[%s1497_s1 + $0x38] sm:$0xff]  ;;  %v1123_v4 = vld [vmem:[%s1497_s1 + $0x30] sm:$0xff]  ;;  %v1122_v8 = vld [vmem:[%s1497_s1 + $0x28] sm:$0xff] }
   0x2   :  { %v1132_v1 = vld [vmem:[%s1497_s1 + $0x78] sm:$0xff]  ;;  %584 = vmatpush.bf16.msra.mxu0 %v1124_v0  ;;  %v1131_v5 = vld [vmem:[%s1497_s1 + $0x70] sm:$0xff]  ;;  %v1130_v9 = vld [vmem:[%s1497_s1 + $0x68] sm:$0xff] }
   0x3   :  { %v1140_v2 = vld [vmem:[%s1497_s1 + $0xb8] sm:$0xff]  ;;  %598 = vmatpush.bf16.msra.mxu1 %v1132_v1  ;;  %v1139_v6 = vld [vmem:[%s1497_s1 + $0xb0] sm:$0xff]  ;;  %v1138_v10 = vld [vmem:[%s1497_s1 + $0xa8] sm:$0xff] }
   0x4   :  { %v1148_v3 = vld [vmem:[%s1497_s1 + $0xf8] sm:$0xff]  ;;  %612 = vmatpush.bf16.msra.mxu2 %v1140_v2  ;;  %v1147_v7 = vld [vmem:[%s1497_s1 + $0xf0] sm:$0xff]  ;;  %v1146_v11 = vld [vmem:[%s1497_s1 + $0xe8] sm:$0xff] }
   0x5   :  { %626 = vmatpush.bf16.msra.mxu3 %v1148_v3  ;;  %v1121_v12 = vld [vmem:[%s1497_s1 + $0x20] sm:$0xff]  ;;  %v1120_v16 = vld [vmem:[%s1497_s1 + $0x18] sm:$0xff]  ;;  %v1119_v20 = vld [vmem:[%s1497_s1 + $0x10] sm:$0xff] }
   0x6   :  { %585 = vmatpush.bf16.msra.mxu0 %v1123_v4  ;;  %v1129_v13 = vld [vmem:[%s1497_s1 + $0x60] sm:$0xff]  ;;  %v1128_v17 = vld [vmem:[%s1497_s1 + $0x58] sm:$0xff]  ;;  %v1127_v21 = vld [vmem:[%s1497_s1 + $0x50] sm:$0xff] }
   0x7   :  { %599 = vmatpush.bf16.msra.mxu1 %v1131_v5  ;;  %v1137_v14 = vld [vmem:[%s1497_s1 + $0xa0] sm:$0xff]  ;;  %v1136_v18 = vld [vmem:[%s1497_s1 + $0x98] sm:$0xff]  ;;  %v1135_v22 = vld [vmem:[%s1497_s1 + $0x90] sm:$0xff] }
   0x8   :  { %613 = vmatpush.bf16.msra.mxu2 %v1139_v6  ;;  %v1145_v15 = vld [vmem:[%s1497_s1 + $0xe0] sm:$0xff]  ;;  %v1144_v19 = vld [vmem:[%s1497_s1 + $0xd8] sm:$0xff]  ;;  %v1143_v23 = vld [vmem:[%s1497_s1 + $0xd0] sm:$0xff] }
   0x9   :  { %627 = vmatpush.bf16.msra.mxu3 %v1147_v7  ;;  %v1118_v24 = vld [vmem:[%s1497_s1 + $0x8] sm:$0xff]  ;;  %v1117_v28 = vld [vmem:[%s1497_s1] sm:$0xff]  ;;  %v1156_v32 = vld [vmem:[%s1497_s1 + $0x138] sm:$0xff] }
   0xa   :  { %586 = vmatpush.bf16.msra.mxu0 %v1122_v8  ;;  %v1126_v25 = vld [vmem:[%s1497_s1 + $0x48] sm:$0xff]  ;;  %v1125_v29 = vld [vmem:[%s1497_s1 + $0x40] sm:$0xff]  ;;  %v1164_v33 = vld [vmem:[%s1497_s1 + $0x178] sm:$0xff] }
   0xb   :  { %600 = vmatpush.bf16.msra.mxu1 %v1130_v9  ;;  %v1134_v26 = vld [vmem:[%s1497_s1 + $0x88] sm:$0xff]  ;;  %v1133_v30 = vld [vmem:[%s1497_s1 + $0x80] sm:$0xff]  ;;  %v1172_v42 = vld [vmem:[%s1497_s1 + $0x1b8] sm:$0xff] }
   0xc   :  { %614 = vmatpush.bf16.msra.mxu2 %v1138_v10  ;;  %v1142_v27 = vld [vmem:[%s1497_s1 + $0xc8] sm:$0xff]  ;;  %v1141_v31 = vld [vmem:[%s1497_s1 + $0xc0] sm:$0xff]  ;;  %v1180_v43 = vld [vmem:[%s1497_s1 + $0x1f8] sm:$0xff] }
   0xd   :  { %628 = vmatpush.bf16.msra.mxu3 %v1146_v11  ;;  %v799_v34 = vld [vmem:[%s1499_s0 + $0x8] sm:$0xf]  ;;  %v791_v36 = vld [vmem:[%s1499_s0] sm:$0xf]  ;;  %v1110_v38 = vld [vmem:[%s1499_s0 + $0xc] sm:$0xf] }
   0xe   :  { %587 = vmatpush.bf16.msra.mxu0 %v1121_v12  ;;  %v1114_v35 = vld [vmem:[%s1499_s0 + $0x24] sm:$0xf0]  ;;  %v1113_v37 = vld [vmem:[%s1499_s0 + $0x1c] sm:$0xf0]  ;;  %v801_v39 = vld [vmem:[%s1499_s0 + $0x28] sm:$0xf0] }
   0xf   :  { %601 = vmatpush.bf16.msra.mxu1 %v1129_v13  ;;  %v1109_v40 = vld [vmem:[%s1499_s0 + $0x4] sm:$0xf]  ;;  %v800_v44 = vor.u32 %v1114_v35, %v799_v34  ;;  %v792_v45 = vor.u32 %v1113_v37, %v791_v36  ;;  %v804_v46 = vor.u32 %v1110_v38, %v801_v39  ;;  %v1155_v48 = vld [vmem:[%s1497_s1 + $0x130] sm:$0xff]  ;;  %v1154_v52 = vld [vmem:[%s1497_s1 + $0x128] sm:$0xff] }
  0x10   :  { %615 = vmatpush.bf16.msra.mxu2 %v1137_v14  ;;  %v793_v41 = vld [vmem:[%s1499_s0 + $0x20] sm:$0xf0]  ;;  %v1163_v49 = vld [vmem:[%s1497_s1 + $0x170] sm:$0xff]  ;;  %v1162_v53 = vld [vmem:[%s1497_s1 + $0x168] sm:$0xff] }
  0x11   :  { %629 = vmatpush.bf16.msra.mxu3 %v1145_v15  ;;  %v796_v47 = vor.u32 %v1109_v40, %v793_v41  ;;  %v1171_v50 = vld [vmem:[%s1497_s1 + $0x1b0] sm:$0xff]  ;;  %v1170_v54 = vld [vmem:[%s1497_s1 + $0x1a8] sm:$0xff]  ;;  %v1153_v56 = vld [vmem:[%s1497_s1 + $0x120] sm:$0xff] }
  0x12   :  { %588 = vmatpush.bf16.msra.mxu0 %v1120_v16  ;;  %v1179_v51 = vld [vmem:[%s1497_s1 + $0x1f0] sm:$0xff]  ;;  %v1178_v55 = vld [vmem:[%s1497_s1 + $0x1e8] sm:$0xff]  ;;  %v1161_v57 = vld [vmem:[%s1497_s1 + $0x160] sm:$0xff] }
  0x13   :  { %602 = vmatpush.bf16.msra.mxu1 %v1128_v17  ;;  %v1169_v58 = vld [vmem:[%s1497_s1 + $0x1a0] sm:$0xff]  ;;  %v1152_v60 = vld [vmem:[%s1497_s1 + $0x118] sm:$0xff]  ;;  %v1151_v0 = vld [vmem:[%s1497_s1 + $0x110] sm:$0xff] }
  0x14   :  { %616 = vmatpush.bf16.msra.mxu2 %v1136_v18  ;;  %v1177_v59 = vld [vmem:[%s1497_s1 + $0x1e0] sm:$0xff]  ;;  %v1160_v61 = vld [vmem:[%s1497_s1 + $0x158] sm:$0xff]  ;;  %v1159_v1 = vld [vmem:[%s1497_s1 + $0x150] sm:$0xff] }
  0x15   :  { %630 = vmatpush.bf16.msra.mxu3 %v1144_v19  ;;  %v1168_v62 = vld [vmem:[%s1497_s1 + $0x198] sm:$0xff]  ;;  %v1167_v2 = vld [vmem:[%s1497_s1 + $0x190] sm:$0xff]  ;;  %v1150_v4 = vld [vmem:[%s1497_s1 + $0x108] sm:$0xff] }
  0x16   :  { %589 = vmatpush.bf16.msra.mxu0 %v1119_v20  ;;  %v1176_v63 = vld [vmem:[%s1497_s1 + $0x1d8] sm:$0xff]  ;;  %v1175_v3 = vld [vmem:[%s1497_s1 + $0x1d0] sm:$0xff]  ;;  %v1158_v5 = vld [vmem:[%s1497_s1 + $0x148] sm:$0xff] }
  0x17   :  { %603 = vmatpush.bf16.msra.mxu1 %v1127_v21  ;;  %v1166_v6 = vld [vmem:[%s1497_s1 + $0x188] sm:$0xff]  ;;  %v1149_v8 = vld [vmem:[%s1497_s1 + $0x100] sm:$0xff]  ;;  %v807_v12 = vld [vmem:[%s1499_s0 + $0x10] sm:$0xf] }
  0x18   :  { %617 = vmatpush.bf16.msra.mxu2 %v1135_v22  ;;  %v1174_v7 = vld [vmem:[%s1497_s1 + $0x1c8] sm:$0xff]  ;;  %v1157_v9 = vld [vmem:[%s1497_s1 + $0x140] sm:$0xff]  ;;  %v1115_v13 = vld [vmem:[%s1499_s0 + $0x2c] sm:$0xf0] }
  0x19   :  { %631 = vmatpush.bf16.msra.mxu3 %v1143_v23  ;;  %v1165_v10 = vld [vmem:[%s1497_s1 + $0x180] sm:$0xff]  ;;  %v1111_v14 = vld [vmem:[%s1499_s0 + $0x14] sm:$0xf]  ;;  %v815_v16 = vld [vmem:[%s1499_s0 + $0x18] sm:$0xf]  ;;  %v808_v20 = vor.u32 %v1115_v13, %v807_v12 }
  0x1a   :  { %590 = vmatpush.bf16.msra.mxu0 %v1118_v24  ;;  %v1173_v11 = vld [vmem:[%s1497_s1 + $0x1c0] sm:$0xff]  ;;  %v809_v15 = vld [vmem:[%s1499_s0 + $0x30] sm:$0xf0]  ;;  %v1116_v17 = vld [vmem:[%s1499_s0 + $0x34] sm:$0xf0] }
  0x1b   :  { %604 = vmatpush.bf16.msra.mxu1 %v1126_v25  ;;  %v1112_v18 = vld [vmem:[%s1499_s0 + $0x1c] sm:$0xf]  ;;  %v812_v21 = vor.u32 %v1111_v14, %v809_v15  ;;  %v816_v22 = vor.u32 %v1116_v17, %v815_v16  ;;  %v1187_v25 = vld [vmem:[%s1501_s3 + $0x30] sm:$0xff]  ;;  %v1189_v34 = vld [vmem:[%s1498_s2] ss:$0 sm:$0xff] }
  0x1c   :  { %618 = vmatpush.bf16.msra.mxu2 %v1134_v26  ;;  %v817_v19 = vld [vmem:[%s1499_s0 + $0x38] sm:$0xf0]  ;;  %v1186_v26 = vld [vmem:[%s1501_s3 + $0x28] sm:$0xff] }
  0x1d   :  { %632 = vmatpush.bf16.msra.mxu3 %v1142_v27  ;;  %v820_v23 = vor.u32 %v1112_v18, %v817_v19  ;;  %v1188_v24 = vld [vmem:[%s1501_s3 + $0x38] sm:$0xff]  ;;  %v1185_v27 = vld [vmem:[%s1501_s3 + $0x20] sm:$0xff] }
  0x1e   :  { %591 = vmatpush.bf16.msra.mxu0 %v1117_v28  ;;  %v1184_v28 = vld [vmem:[%s1501_s3 + $0x18] sm:$0xff] }
  0x1f   :  { %605 = vmatpush.bf16.msra.mxu1 %v1125_v29  ;;  %v1183_v29 = vld [vmem:[%s1501_s3 + $0x10] sm:$0xff] }
  0x20   :  { %619 = vmatpush.bf16.msra.mxu2 %v1133_v30 }
  0x21   :  { %633 = vmatpush.bf16.msra.mxu3 %v1141_v31  ;;  %592 = vmatmul.bf16.vlgmr.msra.gmra.mxu0 %v792_v45  ;;  %v1182_v31 = vld [vmem:[%s1501_s3 + $0x8] sm:$0xff] }
  0x22   :  { %640 = vmatpush.bf16.msrb.mxu0 %v1156_v32  ;;  %606 = vmatmul.bf16.vlgmr.msra.gmra.mxu1 %v796_v47 }
  0x23   :  { %654 = vmatpush.bf16.msrb.mxu1 %v1164_v33  ;;  %620 = vmatmul.bf16.vlgmr.msra.gmra.mxu2 %v800_v44  ;;  %v1181_v33 = vld [vmem:[%s1501_s3] sm:$0xff] }
  0x24   :  { %668 = vmatpush.bf16.msrb.mxu2 %v1172_v42  ;;  %634 = vmatmul.bf16.vlgmr.msra.gmra.mxu3 %v804_v46 }
  0x25   :  { %682 = vmatpush.bf16.msrb.mxu3 %v1180_v43 }
  0x26   :  { %641 = vmatpush.bf16.msrb.mxu0 %v1155_v48 }
  0x27   :  { %655 = vmatpush.bf16.msrb.mxu1 %v1163_v49 }
  0x28   :  { %669 = vmatpush.bf16.msrb.mxu2 %v1171_v50 }
  0x29   :  { %683 = vmatpush.bf16.msrb.mxu3 %v1179_v51 }
  0x2a   :  { %642 = vmatpush.bf16.msrb.mxu0 %v1154_v52 }
  0x2b   :  { %656 = vmatpush.bf16.msrb.mxu1 %v1162_v53 }
  0x2c   :  { %670 = vmatpush.bf16.msrb.mxu2 %v1170_v54 }
  0x2d   :  { %684 = vmatpush.bf16.msrb.mxu3 %v1178_v55 }
  0x2e   :  { %643 = vmatpush.bf16.msrb.mxu0 %v1153_v56 }
  0x2f   :  { %657 = vmatpush.bf16.msrb.mxu1 %v1161_v57 }
  0x30   :  { %671 = vmatpush.bf16.msrb.mxu2 %v1169_v58 }
  0x31   :  { %685 = vmatpush.bf16.msrb.mxu3 %v1177_v59 }
  0x32   :  { %644 = vmatpush.bf16.msrb.mxu0 %v1152_v60 }
  0x33   :  { %658 = vmatpush.bf16.msrb.mxu1 %v1160_v61 }
  0x34   :  { %672 = vmatpush.bf16.msrb.mxu2 %v1168_v62 }
  0x35   :  { %686 = vmatpush.bf16.msrb.mxu3 %v1176_v63 }
  0x36   :  { %645 = vmatpush.bf16.msrb.mxu0 %v1151_v0 }
  0x37   :  { %659 = vmatpush.bf16.msrb.mxu1 %v1159_v1 }
  0x38   :  { %673 = vmatpush.bf16.msrb.mxu2 %v1167_v2 }
  0x39   :  { %687 = vmatpush.bf16.msrb.mxu3 %v1175_v3 }
  0x3a   :  { %646 = vmatpush.bf16.msrb.mxu0 %v1150_v4  ;;  %v1190_v4 = vld [vmem:[%s1500_s4] ss:$0 sm:$0xff] }
  0x3b   :  { %660 = vmatpush.bf16.msrb.mxu1 %v1158_v5 }
  0x3c   :  { %674 = vmatpush.bf16.msrb.mxu2 %v1166_v6 }
  0x3d   :  { %688 = vmatpush.bf16.msrb.mxu3 %v1174_v7 }
  0x3e   :  { %647 = vmatpush.bf16.msrb.mxu0 %v1149_v8 }
  0x3f   :  { %661 = vmatpush.bf16.msrb.mxu1 %v1157_v9 }
  0x40   :  { %675 = vmatpush.bf16.msrb.mxu2 %v1165_v10 }
  0x41   :  { %689 = vmatpush.bf16.msrb.mxu3 %v1173_v11  ;;  %648 = vmatmul.bf16.vlgmr.msrb.gmra.mxu0 %v808_v20 }
  0x42   :  { %662 = vmatmul.bf16.vlgmr.msrb.gmra.mxu1 %v812_v21  ;;  %767 = vmatpush.bf16.msra.mxu0 %v1188_v24 }
  0x43   :  { %676 = vmatmul.bf16.vlgmr.msrb.gmra.mxu2 %v816_v22 }
  0x44   :  { %690 = vmatmul.bf16.vlgmr.msrb.gmra.mxu3 %v820_v23 }
  0x46   :  { %768 = vmatpush.bf16.msra.mxu0 %v1187_v25 }
  0x4a   :  { %769 = vmatpush.bf16.msra.mxu0 %v1186_v26 }
  0x4e   :  { %770 = vmatpush.bf16.msra.mxu0 %v1185_v27 }
  0x52   :  { %771 = vmatpush.bf16.msra.mxu0 %v1184_v28 }
  0x56   :  { %772 = vmatpush.bf16.msra.mxu0 %v1183_v29 }
  0x5a   :  { %773 = vmatpush.bf16.msra.mxu0 %v1182_v31 }
  0x5e   :  { %774 = vmatpush.bf16.msra.mxu0 %v1181_v33 }
  0x9e   :  { %v593_v30 = vpop.f32.mrf.mxu0 }
  0x9f   :  { %v607_v32 = vpop.f32.mrf.mxu1  ;;  %v594_v37 = vadd.f32 %v1189_v34, %v593_v30 }
  0xa1   :  { %v608_v40 = vadd.f32 %v607_v32, %v594_v37 }
  0xa6   :  { %v621_v35 = vpop.f32.mrf.mxu2  ;;  %v595_v38 = vpop.f32.mrf.mxu0 }
  0xa7   :  { %v635_v36 = vpop.f32.mrf.mxu3  ;;  %v609_v39 = vpop.f32.mrf.mxu1  ;;  %v596_v41 = vadd.f32 %v1189_v34, %v595_v38  ;;  %v622_v44 = vadd.f32 %v621_v35, %v608_v40 }
  0xa9   :  { %v610_v45 = vadd.f32 %v609_v39, %v596_v41  ;;  %v636_v48 = vadd.f32 %v635_v36, %v622_v44 }
  0xae   :  { %v623_v42 = vpop.f32.mrf.mxu2 }
  0xaf   :  { %v637_v43 = vpop.f32.mrf.mxu3  ;;  %v624_v49 = vadd.f32 %v623_v42, %v610_v45 }
  0xb1   :  { %v638_v53 = vadd.f32 %v637_v43, %v624_v49 }
  0xbe   :  { %v649_v46 = vpop.f32.mrf.mxu0 }
  0xbf   :  { %v663_v47 = vpop.f32.mrf.mxu1  ;;  %v650_v50 = vadd.f32 %v649_v46, %v636_v48 }
  0xc1   :  { %v664_v55 = vadd.f32 %v663_v47, %v650_v50 }
  0xc6   :  { %v677_v51 = vpop.f32.mrf.mxu2  ;;  %v651_v54 = vpop.f32.mrf.mxu0 }
  0xc7   :  { %v691_v52 = vpop.f32.mrf.mxu3  ;;  %v652_v56 = vadd.f32 %v651_v54, %v638_v53  ;;  %v678_v57 = vadd.f32 %v677_v51, %v664_v55  ;;  %v665_v58 = vpop.f32.mrf.mxu1 }
  0xc9   :  { %v666_v59 = vadd.f32 %v665_v58, %v652_v56  ;;  %v692_v61 = vadd.f32 %v691_v52, %v678_v57 }
  0xcb   :  { %v696_v1 = vmax.f32 %v692_v61, 0.0 }
  0xce   :  { %v679_v60 = vpop.f32.mrf.mxu2 }
  0xcf   :  { %v680_v62 = vadd.f32 %v679_v60, %v666_v59  ;;  %v693_v63 = vpop.f32.mrf.mxu3 }
  0xd1   :  { %v694_v0 = vadd.f32 %v693_v63, %v680_v62 }
  0xd3   :  { %v697_v2 = vmax.f32 %v694_v0, 0.0 }
  0xd5   :  { %v698_v3 = vpack.c.bf16 %v697_v2, %v696_v1 }
  0xd7   :  { %775 = vmatmul.bf16.vlgmr.msra.gmra.mxu0 %v698_v3 }
 0x154   :  { %v776_v5 = vpop.f32.mrf.mxu0 }
 0x155   :  { %v777_v6 = vadd.f32 %v1190_v4, %v776_v5 }
 0x157   :  { %v781_v7 = vmax.f32 %v777_v6, 0.0 }
 0x159   :  { %783 = vst [vmem:[%s1502_s5] sm:$0xff] %v781_v7 }
 0x15c   :  { %v778_v8 = vpop.f32.mrf.mxu0 }
 0x15d   :  { %v779_v9 = vadd.f32 %v1190_v4, %v778_v8 }
 0x15f   :  { %v782_v10 = vmax.f32 %v779_v9, 0.0 }
 0x161   :  { %784 = vst [vmem:[%s1502_s5 + $0x8] sm:$0xff] %v782_v10 }

</bundles_post_ra>
